<compile_context>
chip_gen: v6e
topology: v6e:2x2x1
jax: 0.10.0
libtpu: 0.0.40
codegen_flags: <defaults>
</compile_context>

<pallas_src>
import jax
import jax.numpy as jnp
from jax.experimental import pallas as pl
from jax.experimental.pallas import tpu as pltpu

# ----------------------------- problem sizes --------------------------------
K = 3                      # kernel_size[0]
STRIDE = 1                 # stride[0]
CIN = 7
COUT = 32
H, W = 16, 30
HC = (H - K) // STRIDE + 1     # 14  (conv1 output height)
WC = (W - K) // STRIDE + 1     # 28  (conv1 output width)
HP, WP = HC // 2, WC // 2      # 7, 14 (after 2x2 max-pool)
NPOOL = HP * WP                # 98 pooled spatial positions
HPAD = ((NPOOL + 7) // 8) * 8  # 104: 8-sublane aligned slab height
KKC = K * K * CIN              # 63 im2col patch width
FLAT = COUT * NPOOL            # 3136 == fc1.in_features
FC1_OUT = 128
FC2_OUT = 2


# ------------------------------- kernel --------------------------------------
def fused_cnn_kernel(patch_ref, wc_ref, bc_ref, wf_ref, bf_ref, o_ref):
    # patch_ref: (1, 4*HPAD, KKC)  im2col patches for one batch element.
    #            Slab p (rows [p*HPAD, p*HPAD+NPOOL)) holds the conv patches at
    #            pool offset p = 2a+b; rows NPOOL..HPAD-1 are zero padding.
    # wc_ref:    (KKC, COUT) conv weight,  bc_ref: (1, COUT) conv bias
    # wf_ref:    (FC2_OUT, HPAD, COUT) merged fc1@fc2 weight, permuted to the
    #            pooled (hw, c) layout; pad rows (>= NPOOL) are zero.
    # bf_ref:    (1, FC2_OUT) merged bias
    # o_ref:     (1, 1, FC2_OUT) final logits for this batch element
    y = jnp.dot(patch_ref[0], wc_ref[...],
                preferred_element_type=jnp.float32)          # (4*HPAD, COUT) conv1
    y = jnp.maximum(y + bc_ref[...], 0.0)                    # bias + ReLU

    # 2x2 max-pool == max over the 4 pool-offset slabs (8-aligned static slices).
    pooled = jnp.maximum(
        jnp.maximum(y[0 * HPAD:1 * HPAD], y[1 * HPAD:2 * HPAD]),
        jnp.maximum(y[2 * HPAD:3 * HPAD], y[3 * HPAD:4 * HPAD]))   # (HPAD, COUT)

    # Merged fc1+fc2: out_o = sum_{hw,c} pooled[hw,c] * wf[o,hw,c]  (+ bias).
    outs = []
    for o in range(FC2_OUT):
        s = jnp.sum(pooled * wf_ref[o], axis=1, keepdims=True)     # (HPAD, 1)
        outs.append(jnp.sum(s, axis=0, keepdims=True))             # (1, 1)
    o_ref[0] = jnp.concatenate(outs, axis=1) + bf_ref[...]         # (1, FC2_OUT)


# ------------------------------- glue ----------------------------------------
def im2col_pool_offsets(x):
    """x: (N, H, W, CIN) -> (N, 4*HPAD, K*K*CIN).

    Slab p = 2a+b, row hw = i*WP + j holds the flattened (kh, kw, cin) conv
    patch at conv-output position (2i+a, 2j+b), i.e. the 4 positions covered
    by pool window (i, j).  Rows NPOOL..HPAD-1 of each slab are zero."""
    # TODO(synk): for large batches move im2col into the kernel (DMA the raw
    # (H, W, CIN) block, build taps with strided slices) to avoid the ~7x HBM
    # inflation of the patch tensor; irrelevant at the toy N=2 used here.
    n = x.shape[0]
    slabs = []
    for a in range(2):
        for b in range(2):
            taps = []
            for kh in range(K):
                for kw in range(K):
                    sl = x[:, a + kh: a + kh + 2 * HP: 2,
                              b + kw: b + kw + 2 * WP: 2, :]      # (N, HP, WP, CIN)
                    taps.append(sl)
            patch = jnp.concatenate(taps, axis=-1).reshape(n, NPOOL, KKC)
            patch = jnp.pad(patch, ((0, 0), (0, HPAD - NPOOL), (0, 0)))
            slabs.append(patch)
    return jnp.concatenate(slabs, axis=1)                          # (N, 4*HPAD, KKC)


def prepare_kernel_params(params):
    """One-time fold of the PyTorch-layout params into the fused-kernel layout."""
    w_conv_oihw, b_conv, w1f, b1f, w2f, b2f = params
    # conv weight OIHW -> (kh, kw, cin) x cout matmul layout (matches im2col order)
    wc = jnp.transpose(w_conv_oihw, (2, 3, 1, 0)).reshape(KKC, COUT)
    bc = b_conv.reshape(1, COUT)
    # fc1 and fc2 merged (no nonlinearity between them in forward()).
    wf_flat = w1f @ w2f                               # (FLAT, FC2_OUT)
    bf = b1f @ w2f + b2f                              # (1, FC2_OUT)
    # PyTorch flattens NCHW in (c, hw) order; permute rows to the kernel's
    # (hw, c) pooled layout so no transpose is needed between pool and FC,
    # then zero-pad the hw axis to HPAD.
    wf = jnp.transpose(wf_flat.reshape(COUT, NPOOL, FC2_OUT), (2, 1, 0))
    wf = jnp.pad(wf, ((0, 0), (0, HPAD - NPOOL), (0, 0)))  # (FC2_OUT, HPAD, COUT)
    return wc, bc, wf, bf


def cnn_forward(x, kernel_params):
    wc, bc, wf, bf = kernel_params
    x = x.astype(jnp.float32)            # torch.tensor(input, dtype=torch.float)
    n = x.shape[0]

    patches = im2col_pool_offsets(x)     # (N, 4*HPAD, KKC)

    out = pl.pallas_call(
        fused_cnn_kernel,
        out_shape=jax.ShapeDtypeStruct((n, 1, FC2_OUT), jnp.float32),
        grid_spec=pltpu.PrefetchScalarGridSpec(
            num_scalar_prefetch=0,
            grid=(n,),
            in_specs=[
                pl.BlockSpec((1, 4 * HPAD, KKC), lambda b: (b, 0, 0)),
                # weight index_maps are constant in b -> weights stay VMEM-resident
                pl.BlockSpec((KKC, COUT), lambda b: (0, 0)),
                pl.BlockSpec((1, COUT), lambda b: (0, 0)),
                pl.BlockSpec((FC2_OUT, HPAD, COUT), lambda b: (0, 0, 0)),
                pl.BlockSpec((1, FC2_OUT), lambda b: (0, 0)),
            ],
            out_specs=pl.BlockSpec((1, 1, FC2_OUT), lambda b: (b, 0, 0)),
        ),
        compiler_params=pltpu.CompilerParams(
            dimension_semantics=("parallel",)),
    )(patches, wc, bc, wf, bf)
    return out.reshape(n, FC2_OUT)


def reference_forward(x, params):
    """Pure-JAX reference matching the PyTorch forward semantics (unfused fc1/fc2)."""
    w_conv_oihw, b_conv, w1f, b1f, w2f, b2f = params
    x = x.astype(jnp.float32)
    w_hwio = jnp.transpose(w_conv_oihw, (2, 3, 1, 0))
    conv = jax.lax.conv_general_dilated(
        x, w_hwio, (STRIDE, STRIDE), "VALID",
        dimension_numbers=("NHWC", "HWIO", "NHWC")) + b_conv.reshape(1, 1, 1, COUT)
    conv = jnp.maximum(conv, 0.0)
    pooled = jax.lax.reduce_window(conv, -jnp.inf, jax.lax.max,
                                   (1, 2, 2, 1), (1, 2, 2, 1), "VALID")
    flat = jnp.transpose(pooled, (0, 3, 1, 2)).reshape(x.shape[0], FLAT)
    return (flat @ w1f + b1f) @ w2f + b2f


# --------------------------------- main --------------------------------------
if __name__ == "__main__":
    key = jax.random.PRNGKey(0)
    kx, k1, k2, k3, k4, k5, k6 = jax.random.split(key, 7)

    # Input in NHWC, as fed to the PyTorch module before its internal permute.
    x = jax.random.normal(kx, (2, H, W, CIN), dtype=jnp.float32)

    # Params generated in the PyTorch layouts.
    w_conv_oihw = jax.random.normal(k1, (COUT, CIN, K, K), dtype=jnp.float32) * 0.05
    b_conv = jax.random.normal(k2, (COUT,), dtype=jnp.float32) * 0.05
    w1f = jax.random.normal(k3, (FLAT, FC1_OUT), dtype=jnp.float32) * 0.02
    b1f = jax.random.normal(k4, (1, FC1_OUT), dtype=jnp.float32) * 0.02
    w2f = jax.random.normal(k5, (FC1_OUT, FC2_OUT), dtype=jnp.float32) * 0.02
    b2f = jax.random.normal(k6, (1, FC2_OUT), dtype=jnp.float32) * 0.02
    params = (w_conv_oihw, b_conv, w1f, b1f, w2f, b2f)

    kernel_params = jax.tree_util.tree_map(
        jax.block_until_ready, prepare_kernel_params(params))

    fwd = jax.jit(cnn_forward)
    out = jax.block_until_ready(fwd(x, kernel_params))
    assert out.shape == (2, FC2_OUT), out.shape

    ref = jax.block_until_ready(reference_forward(x, params))
    assert jnp.allclose(out, ref, rtol=1e-3, atol=1e-3), (out, ref)

    print("KERNEL_OK")
</pallas_src>

<mosaic_0001>
module attributes {stable_mosaic.version = 11 : i64} {
  func.func @fused_cnn_kernel(%arg0: i32, %arg1: memref<1x416x63xf32, #tpu.memory_space<vmem>>, %arg2: memref<63x32xf32, #tpu.memory_space<vmem>>, %arg3: memref<1x32xf32, #tpu.memory_space<vmem>>, %arg4: memref<2x104x32xf32, #tpu.memory_space<vmem>>, %arg5: memref<1x2xf32, #tpu.memory_space<vmem>>, %arg6: memref<1x1x2xf32, #tpu.memory_space<vmem>>) attributes {dimension_semantics = [#tpu.dimension_semantics<parallel>], iteration_bounds = array<i64: 2>, scalar_prefetch = 0 : i64, scratch_operands = 0 : i64, tpu.core_type = #tpu.core_type<tc>, window_params = [{transform_indices = @transform_0, window_bounds = array<i64: 1, 416, 63>}, {pipeline_mode = #tpu.pipeline_mode<synchronous>, transform_indices = @transform_1, window_bounds = array<i64: 63, 32>}, {pipeline_mode = #tpu.pipeline_mode<synchronous>, transform_indices = @transform_2, window_bounds = array<i64: 1, 32>}, {pipeline_mode = #tpu.pipeline_mode<synchronous>, transform_indices = @transform_3, window_bounds = array<i64: 2, 104, 32>}, {pipeline_mode = #tpu.pipeline_mode<synchronous>, transform_indices = @transform_4, window_bounds = array<i64: 1, 2>}, {transform_indices = @transform_5, window_bounds = array<i64: 1, 1, 2>}]} {
    %c0 = arith.constant 0 : index
    %c0_0 = arith.constant 0 : index
    %c0_1 = arith.constant 0 : index
    %0 = vector.load %arg1[%c0, %c0_0, %c0_1] : memref<1x416x63xf32, #tpu.memory_space<vmem>>, vector<1x416x63xf32>
    %1 = vector.shape_cast %0 : vector<1x416x63xf32> to vector<416x63xf32>
    %c0_2 = arith.constant 0 : index
    %c0_3 = arith.constant 0 : index
    %2 = vector.load %arg2[%c0_2, %c0_3] : memref<63x32xf32, #tpu.memory_space<vmem>>, vector<63x32xf32>
    %cst = arith.constant dense<0.000000e+00> : vector<416x32xf32>
    %3 = tpu.matmul %1, %2, %cst {dimension_numbers = #tpu.dot_dimension_numbers<[1], [0], [0], [1], [0, 0, 1, 1], [], []>} : vector<416x63xf32>, vector<63x32xf32>, vector<416x32xf32> -> vector<416x32xf32>
    %c0_4 = arith.constant 0 : index
    %c0_5 = arith.constant 0 : index
    %4 = vector.load %arg3[%c0_4, %c0_5] : memref<1x32xf32, #tpu.memory_space<vmem>>, vector<1x32xf32>
    %5 = vector.broadcast %4 : vector<1x32xf32> to vector<416x32xf32>
    %6 = arith.addf %3, %5 : vector<416x32xf32>
    %cst_6 = arith.constant 0.000000e+00 : f32
    %7 = vector.broadcast %cst_6 : f32 to vector<416x32xf32>
    %8 = arith.maximumf %6, %7 : vector<416x32xf32>
    %9 = vector.extract_strided_slice %8 {offsets = [0, 0], sizes = [104, 32], strides = [1, 1]} : vector<416x32xf32> to vector<104x32xf32>
    %10 = vector.extract_strided_slice %8 {offsets = [104, 0], sizes = [104, 32], strides = [1, 1]} : vector<416x32xf32> to vector<104x32xf32>
    %11 = arith.maximumf %9, %10 : vector<104x32xf32>
    %12 = vector.extract_strided_slice %8 {offsets = [208, 0], sizes = [104, 32], strides = [1, 1]} : vector<416x32xf32> to vector<104x32xf32>
    %13 = vector.extract_strided_slice %8 {offsets = [312, 0], sizes = [104, 32], strides = [1, 1]} : vector<416x32xf32> to vector<104x32xf32>
    %14 = arith.maximumf %12, %13 : vector<104x32xf32>
    %15 = arith.maximumf %11, %14 : vector<104x32xf32>
    %c0_7 = arith.constant 0 : index
    %c0_8 = arith.constant 0 : index
    %c0_9 = arith.constant 0 : index
    %16 = vector.load %arg4[%c0_7, %c0_8, %c0_9] : memref<2x104x32xf32, #tpu.memory_space<vmem>>, vector<1x104x32xf32>
    %17 = vector.shape_cast %16 : vector<1x104x32xf32> to vector<104x32xf32>
    %18 = arith.mulf %15, %17 : vector<104x32xf32>
    %cst_10 = arith.constant dense<0.000000e+00> : vector<104xf32>
    %19 = vector.multi_reduction <add>, %18, %cst_10 [1] : vector<104x32xf32> to vector<104xf32>
    %20 = vector.shape_cast %19 : vector<104xf32> to vector<104x1xf32>
    %cst_11 = arith.constant dense<0.000000e+00> : vector<1xf32>
    %21 = vector.multi_reduction <add>, %20, %cst_11 [0] : vector<104x1xf32> to vector<1xf32>
    %22 = vector.shape_cast %21 : vector<1xf32> to vector<1x1xf32>
    %c1 = arith.constant 1 : index
    %c0_12 = arith.constant 0 : index
    %c0_13 = arith.constant 0 : index
    %23 = vector.load %arg4[%c1, %c0_12, %c0_13] : memref<2x104x32xf32, #tpu.memory_space<vmem>>, vector<1x104x32xf32>
    %24 = vector.shape_cast %23 : vector<1x104x32xf32> to vector<104x32xf32>
    %25 = arith.mulf %15, %24 : vector<104x32xf32>
    %cst_14 = arith.constant dense<0.000000e+00> : vector<104xf32>
    %26 = vector.multi_reduction <add>, %25, %cst_14 [1] : vector<104x32xf32> to vector<104xf32>
    %27 = vector.shape_cast %26 : vector<104xf32> to vector<104x1xf32>
    %cst_15 = arith.constant dense<0.000000e+00> : vector<1xf32>
    %28 = vector.multi_reduction <add>, %27, %cst_15 [0] : vector<104x1xf32> to vector<1xf32>
    %29 = vector.shape_cast %28 : vector<1xf32> to vector<1x1xf32>
    %30 = tpu.concatenate %22, %29 in 1 : vector<1x1xf32>, vector<1x1xf32> -> vector<1x2xf32>
    %c0_16 = arith.constant 0 : index
    %c0_17 = arith.constant 0 : index
    %31 = vector.load %arg5[%c0_16, %c0_17] : memref<1x2xf32, #tpu.memory_space<vmem>>, vector<1x2xf32>
    %32 = arith.addf %30, %31 : vector<1x2xf32>
    %c0_18 = arith.constant 0 : index
    %c0_19 = arith.constant 0 : index
    %c0_20 = arith.constant 0 : index
    %33 = vector.load %arg6[%c0_18, %c0_19, %c0_20] : memref<1x1x2xf32, #tpu.memory_space<vmem>>, vector<1x1x2xf32>
    %34 = vector.shape_cast %33 : vector<1x1x2xf32> to vector<1x2xf32>
    %35 = vector.shape_cast %32 : vector<1x2xf32> to vector<1x1x2xf32>
    tpu.vector_store %arg6[%c0_18, %c0_19, %c0_20], %35 {strides = array<i32>} : memref<1x1x2xf32, #tpu.memory_space<vmem>>, vector<1x1x2xf32>,
    return
  }
  func.func @transform_0(%arg0: i32) -> (i32, i32, i32) {
    %c0_i32 = arith.constant 0 : i32
    %c0_i32_0 = arith.constant 0 : i32
    %c0_i32_1 = arith.constant 0 : i32
    return %arg0, %c0_i32, %c0_i32_0 : i32, i32, i32
  }
  func.func @transform_1(%arg0: i32) -> (i32, i32) {
    %c0_i32 = arith.constant 0 : i32
    %c0_i32_0 = arith.constant 0 : i32
    %c0_i32_1 = arith.constant 0 : i32
    return %c0_i32, %c0_i32_0 : i32, i32
  }
  func.func @transform_2(%arg0: i32) -> (i32, i32) {
    %c0_i32 = arith.constant 0 : i32
    %c0_i32_0 = arith.constant 0 : i32
    %c0_i32_1 = arith.constant 0 : i32
    return %c0_i32, %c0_i32_0 : i32, i32
  }
  func.func @transform_3(%arg0: i32) -> (i32, i32, i32) {
    %c0_i32 = arith.constant 0 : i32
    %c0_i32_0 = arith.constant 0 : i32
    %c0_i32_1 = arith.constant 0 : i32
    %c0_i32_2 = arith.constant 0 : i32
    return %c0_i32, %c0_i32_0, %c0_i32_1 : i32, i32, i32
  }
  func.func @transform_4(%arg0: i32) -> (i32, i32) {
    %c0_i32 = arith.constant 0 : i32
    %c0_i32_0 = arith.constant 0 : i32
    %c0_i32_1 = arith.constant 0 : i32
    return %c0_i32, %c0_i32_0 : i32, i32
  }
  func.func @transform_5(%arg0: i32) -> (i32, i32, i32) {
    %c0_i32 = arith.constant 0 : i32
    %c0_i32_0 = arith.constant 0 : i32
    %c0_i32_1 = arith.constant 0 : i32
    return %arg0, %c0_i32, %c0_i32_0 : i32, i32, i32
  }
}

</mosaic_0001>

<bundles_post_ra>
// kernel: cnn_forward.1
= control target key start
LH: loop header
LB: loop body
LE: loop exit
PB: predicated region body
PF: predicated region fallthrough
CT: control target
= control target key end

     0   :  { %10 = vsyncpa [#allocation3], 0  ;;  %s1927_s0 = inlined_call_operand.vmem [shape: f32[2,416,63], index: 0, kind: input, shape index: {}]   ;;  %s1928_s1 = inlined_call_operand.vmem [shape: f32[63,32], index: 1, kind: input, shape index: {}]   ;;  %s1929_s2 = inlined_call_operand.vmem [shape: f32[1,32], index: 2, kind: input, shape index: {}]   ;;  %s1930_s3 = inlined_call_operand.vmem [shape: f32[2,104,32], index: 3, kind: input, shape index: {}]   ;;  %s1931_s4 = inlined_call_operand.vmem [shape: f32[1,2], index: 4, kind: input, shape index: {}]   ;;  %s1932_s5 = inlined_call_operand.hbm [shape: f32[2,1,2], index: 5, kind: output, shape index: {}]  }
   0x1   :  { %12 = vsyncpa [#allocation3 + $0x1], 0  ;;  %s1486_s18 = smov 0   ;;  %s1488_s19 = smov 0  }
   0x2   :  { %s1490_s20 = smov 0   ;;  %s1492_s21 = smov 0  }
   0x3 LB: > { %s1507_s22 = sadd.s32 4294967295, %s1453_s21   ;;  %s1108_s23 = sadd.s32 4294967294, %s1453_s21   ;;  %s1453_s21 = sphi %s1492_s21, %s1938_s21   ;;  %s1449_s20 = sphi %s1490_s20, %s1937_s20   ;;  %s1445_s19 = sphi %s1488_s19, %s1936_s19   ;;  %s1441_s18 = sphi %s1486_s18, %s1935_s18  }
   0x4   : > { %s1511_s24 = sadd.s32 1, %s1453_s21   ;;  %s135_s25 = sadd.s32 1, %s1449_s20 }
   0x5   : > { %s132_s26 = ssub.s32 %s1453_s21, %s1511_s24  ;;  %p145_p0 = scmp.ne.s32.totalorder %s1449_s20, %s1445_s19 }
   0x6   : > { %p133_p1 = scmp.eq.s32.totalorder %s132_s26, 0  ;;  %p146_p2 = scmp.eq.s32.totalorder %s1507_s22, 1 }
   0x7   : > { %p151_p3 = scmp.ne.s32.totalorder %s1445_s19, %s1441_s18  ;;  %p152_p4 = scmp.eq.s32.totalorder %s1108_s23, 1 }
   0x8   : > { %s1522_s27 = scalar_select %p133_p1, %s1449_s20, %s135_s25  }
   0x9   : > { %p1524_p5 = por %p146_p2, %p145_p0  ;;  %p1528_p6 = por %p152_p4, %p151_p3 }
   0xa   : > { %p1111_p7 = scmp.ge.s32.totalorder %s1453_s21, 1  ;;  %p190_p8 = scmp.lt.s32.totalorder %s1453_s21, 3 }
   0xc   : > { %p191_p9 = pnand %p1111_p7, %p190_p8 }
   0xd   : > { %p217_p10 = scmp.lt.s32.totalorder (!%p191_p9), %s1507_s22, 1  ;;  %s1180_s25 = sshll.u32 (!%p191_p9), %s1507_s22, 4 }
   0xe   : > { %194 = sbr.rel (%p191_p9) target bundleno = 485 (0x1e5), region = 40  ;;  %s1051_s8 = scalar_lea.hbm (!%p191_p9), %s1932_s5, %s1180_s25 }
  0x13   : > { %v281_v0 = vld [vmem:[%s1928_s1 + $0x38] sm:$0x7f]  ;;  %vm446_vm0 = vcmask 1046528   ;;  %v280_v1 = vld [vmem:[%s1928_s1 + $0x30] sm:$0xff]  ;;  %v279_v2 = vld [vmem:[%s1928_s1 + $0x28] sm:$0xff]  ;;  %s218_s11 = scalar_select %p217_p10, %s1507_s22, 1 }
  0x14   : > { %1243 = vmatprep.subr.msk.mxu0 %vm446_vm0, %v281_v0  ;;  %1337 = vmatprep.subr.msk.mxu1 %vm446_vm0, %v281_v0  ;;  %v278_v3 = vld [vmem:[%s1928_s1 + $0x20] sm:$0xff]  ;;  %v277_v4 = vld [vmem:[%s1928_s1 + $0x18] sm:$0xff]  ;;  %v276_v5 = vld [vmem:[%s1928_s1 + $0x10] sm:$0xff]  ;;  %vm289_vm1 = vcmask 515072   ;;  %vm892_vm2 = vcmask 261120   ;;  %vm1034_vm3 = vcmask 7168  }
  0x15   : > { %1244 = vmatpush3.msk.msra.mxu0 %vm446_vm0, %v281_v0  ;;  %1345 = vmatpush3.msk.msra.mxu1 %vm446_vm0, %v281_v0  ;;  %s1353_s16 = smul.u32 416, %s218_s11  ;;  %v275_v6 = vld [vmem:[%s1928_s1 + $0x8] sm:$0xff]  ;;  %v274_v7 = vld [vmem:[%s1928_s1] sm:$0xff]  ;;  %vm1038_vm4 = vcmask 8192   ;;  %s1455_s11 = smov [#allocation2]  }
  0x16   : > { %1245 = vmatprep.subr.mxu0 %v280_v1  ;;  %1338 = vmatprep.subr.mxu1 %v280_v1  ;;  %s1397_s12 = sshll.u32 %s1455_s11, 4  ;;  %s1398_s12 = int_to_ptr.vmem [resolvable:$false] %s1397_s12 }
  0x17   : > { %1246 = vmatpush3.msra.mxu0 %v280_v1  ;;  %1346 = vmatpush3.msra.mxu1 %v280_v1  ;;  %s1560_s7 = scalar_lea.vmem %s1927_s0, %s1353_s16  ;;  %s215_s16 = sand.u32 1, %s1445_s19  }
  0x18   : > { %1247 = vmatprep.subr.mxu0 %v279_v2  ;;  %1339 = vmatprep.subr.mxu1 %v279_v2  ;;  %v222_v8 = vld [vmem:[%s1560_s7] sm:$0xff]  ;;  %v248_v9 = vld [vmem:[%s1560_s7 + $0xd0] sm:$0xff]  ;;  %v223_v10 = vld [vmem:[%s1560_s7 + $0x8] sm:$0xff]  ;;  %s216_s26 = scalar_lea.vmem [#allocation2], %s215_s16  ;;  %s1041_s9 = scalar_lea.sflag [#allocation3], %s215_s16 }
  0x19   : > { %1248 = vmatpush3.msra.mxu0 %v279_v2  ;;  %1347 = vmatpush3.msra.mxu1 %v279_v2  ;;  %v249_v11 = vld [vmem:[%s1560_s7 + $0xd8] sm:$0xff]  ;;  %v224_v12 = vld [vmem:[%s1560_s7 + $0x10] sm:$0xff]  ;;  %v250_v13 = vld [vmem:[%s1560_s7 + $0xe0] sm:$0xff]  ;;  %s1053_s30 = sshll.u32 %s216_s26, 4  ;;  %s1399_s22 = scalar_lea.vmem %s1398_s12, 32  ;;  %s1054_s30 = int_to_ptr.vmem [resolvable:$true] %s1053_s30 }
  0x1a   : > { %1249 = vmatprep.subr.mxu0 %v278_v3  ;;  %1340 = vmatprep.subr.mxu1 %v278_v3  ;;  %v225_v14 = vld [vmem:[%s1560_s7 + $0x18] sm:$0xff]  ;;  %v251_v15 = vld [vmem:[%s1560_s7 + $0xe8] sm:$0xff]  ;;  %v226_v16 = vld [vmem:[%s1560_s7 + $0x20] sm:$0xff]  ;;  %s1393_s10 = scalar_lea.vmem %s1054_s30, 16  ;;  %p1400_p0 = scmp.lt.s32.totalorder %s1054_s30, %s1398_s12 }
  0x1b   : > { %1250 = vmatpush3.msra.mxu0 %v278_v3  ;;  %1348 = vmatpush3.msra.mxu1 %v278_v3  ;;  %v252_v17 = vld [vmem:[%s1560_s7 + $0xf0] sm:$0xff]  ;;  %v227_v18 = vld [vmem:[%s1560_s7 + $0x28] sm:$0xff]  ;;  %v253_v19 = vld [vmem:[%s1560_s7 + $0xf8] sm:$0xff]  ;;  %p1394_p11 = scmp.ne.s32.totalorder %s1054_s30, %s1393_s10  ;;  %p1401_p1 = scmp.lt.s32.totalorder %s1399_s22, %s1393_s10 }
  0x1c   : > { %1251 = vmatprep.subr.mxu0 %v277_v4  ;;  %1341 = vmatprep.subr.mxu1 %v277_v4  ;;  %v228_v20 = vld [vmem:[%s1560_s7 + $0x30] sm:$0xff]  ;;  %v254_v21 = vld [vmem:[%s1560_s7 + $0x100] sm:$0xff]  ;;  %v229_v22 = vld [vmem:[%s1560_s7 + $0x38] sm:$0xff] }
  0x1d   : > { %1252 = vmatpush3.msra.mxu0 %v277_v4  ;;  %1349 = vmatpush3.msra.mxu1 %v277_v4  ;;  %v255_v23 = vld [vmem:[%s1560_s7 + $0x108] sm:$0xff]  ;;  %v230_v24 = vld [vmem:[%s1560_s7 + $0x40] sm:$0xff]  ;;  %v256_v25 = vld [vmem:[%s1560_s7 + $0x110] sm:$0xff]  ;;  %p1395_p12 = pnand %p1394_p11, %p1524_p5  ;;  %p1402_p2 = por %p1401_p1, %p1400_p0 }
  0x1e   : > { %1253 = vmatprep.subr.mxu0 %v276_v5  ;;  %1342 = vmatprep.subr.mxu1 %v276_v5  ;;  %v231_v26 = vld [vmem:[%s1560_s7 + $0x48] sm:$0xff]  ;;  %v257_v27 = vld [vmem:[%s1560_s7 + $0x118] sm:$0xff]  ;;  %v232_v28 = vld [vmem:[%s1560_s7 + $0x50] sm:$0xff] }
  0x1f   : > { %1254 = vmatpush3.msra.mxu0 %v276_v5  ;;  %1350 = vmatpush3.msra.mxu1 %v276_v5  ;;  %v258_v29 = vld [vmem:[%s1560_s7 + $0x120] sm:$0xff]  ;;  %v233_v30 = vld [vmem:[%s1560_s7 + $0x58] sm:$0xff]  ;;  %v259_v31 = vld [vmem:[%s1560_s7 + $0x128] sm:$0xff]  ;;  %p1396_p13 = pneg %p1395_p12 }
  0x20   : > { %1255 = vmatprep.subr.mxu0 %v275_v6  ;;  %1343 = vmatprep.subr.mxu1 %v275_v6  ;;  %v234_v32 = vld [vmem:[%s1560_s7 + $0x60] sm:$0xff]  ;;  %v260_v33 = vld [vmem:[%s1560_s7 + $0x130] sm:$0xff]  ;;  %v235_v34 = vld [vmem:[%s1560_s7 + $0x68] sm:$0xff] }
  0x21   : > { %1256 = vmatpush3.msra.mxu0 %v275_v6  ;;  %1351 = vmatpush3.msra.mxu1 %v275_v6  ;;  %v261_v35 = vld [vmem:[%s1560_s7 + $0x138] sm:$0xff]  ;;  %v236_v36 = vld [vmem:[%s1560_s7 + $0x70] sm:$0xff]  ;;  %v262_v37 = vld [vmem:[%s1560_s7 + $0x140] sm:$0xff]  ;;  %p1403_p3 = pnand %p1402_p2, %p1396_p13 }
  0x22   : > { %1257 = vmatprep.subr.mxu0 %v274_v7  ;;  %1344 = vmatprep.subr.mxu1 %v274_v7  ;;  %v237_v38 = vld [vmem:[%s1560_s7 + $0x78] sm:$0xff]  ;;  %v263_v39 = vld [vmem:[%s1560_s7 + $0x148] sm:$0xff]  ;;  %v238_v40 = vld [vmem:[%s1560_s7 + $0x80] sm:$0xff] }
  0x23   : > { %1258 = vmatpush3.msra.mxu0 %v274_v7  ;;  %1352 = vmatpush3.msra.mxu1 %v274_v7  ;;  %v264_v41 = vld [vmem:[%s1560_s7 + $0x150] sm:$0xff]  ;;  %v239_v42 = vld [vmem:[%s1560_s7 + $0x88] sm:$0xff]  ;;  %v265_v43 = vld [vmem:[%s1560_s7 + $0x158] sm:$0xff] }
  0x24   : > { %1259 = vmatprep.mubr.msk.f32.mxu0 %vm289_vm1, %v222_v8  ;;  %1298 = vmatprep.mubr.msk.f32.mxu1 %vm289_vm1, %v248_v9  ;;  %v240_v44 = vld [vmem:[%s1560_s7 + $0x90] sm:$0xff]  ;;  %v266_v45 = vld [vmem:[%s1560_s7 + $0x160] sm:$0xff]  ;;  %v241_v46 = vld [vmem:[%s1560_s7 + $0x98] sm:$0xff] }
  0x25   : > { %1260 = vmatmul.mubr.msk.f32.vlgmr.msra.gmra.mxu0 %vm289_vm1, %v223_v10  ;;  %1299 = vmatmul.mubr.msk.f32.vlgmr.msra.gmra.mxu1 %vm289_vm1, %v249_v11  ;;  %v267_v47 = vld [vmem:[%s1560_s7 + $0x168] sm:$0xff]  ;;  %v242_v48 = vld [vmem:[%s1560_s7 + $0xa0] sm:$0xff]  ;;  %v268_v49 = vld [vmem:[%s1560_s7 + $0x170] sm:$0xff] }
  0x26   : > { %1262 = vmatprep.mubr.msk.f32.mxu0 %vm289_vm1, %v224_v12  ;;  %1301 = vmatprep.mubr.msk.f32.mxu1 %vm289_vm1, %v250_v13  ;;  %v243_v50 = vld [vmem:[%s1560_s7 + $0xa8] sm:$0xff]  ;;  %v269_v51 = vld [vmem:[%s1560_s7 + $0x178] sm:$0xff]  ;;  %v244_v52 = vld [vmem:[%s1560_s7 + $0xb0] sm:$0xff] }
  0x27   : > { %v270_v53 = vld [vmem:[%s1560_s7 + $0x180] sm:$0xff]  ;;  %v245_v54 = vld [vmem:[%s1560_s7 + $0xb8] sm:$0xff]  ;;  %v271_v55 = vld [vmem:[%s1560_s7 + $0x188] sm:$0xff] }
  0x28   : > { %v246_v56 = vld [vmem:[%s1560_s7 + $0xc0] sm:$0xff]  ;;  %v272_v57 = vld [vmem:[%s1560_s7 + $0x190] sm:$0xff]  ;;  %v247_v58 = vld [vmem:[%s1560_s7 + $0xc8] sm:$0xff] }
  0x29   : > { %1263 = vmatmul.mubr.msk.f32.gmra.mxu0 %vm289_vm1, %v225_v14  ;;  %1302 = vmatmul.mubr.msk.f32.gmra.mxu1 %vm289_vm1, %v251_v15  ;;  %v273_v59 = vld [vmem:[%s1560_s7 + $0x198] sm:$0xff] }
  0x2a   : > { %1265 = vmatprep.mubr.msk.f32.mxu0 %vm289_vm1, %v226_v16  ;;  %1304 = vmatprep.mubr.msk.f32.mxu1 %vm289_vm1, %v252_v17 }
  0x2d   : > { %1266 = vmatmul.mubr.msk.f32.gmra.mxu0 %vm289_vm1, %v227_v18  ;;  %1305 = vmatmul.mubr.msk.f32.gmra.mxu1 %vm289_vm1, %v253_v19  ;;  %v1704_v18 = vld [vmem:[%s1929_s2] ss:$0 sm:$0xff] }
  0x2e   : > { %1268 = vmatprep.mubr.msk.f32.mxu0 %vm289_vm1, %v228_v20  ;;  %1307 = vmatprep.mubr.msk.f32.mxu1 %vm289_vm1, %v254_v21 }
  0x31   : > { %1269 = vmatmul.mubr.msk.f32.gmra.mxu0 %vm289_vm1, %v229_v22  ;;  %1308 = vmatmul.mubr.msk.f32.gmra.mxu1 %vm289_vm1, %v255_v23 }
  0x32   : > { %1271 = vmatprep.mubr.msk.f32.mxu0 %vm289_vm1, %v230_v24  ;;  %1310 = vmatprep.mubr.msk.f32.mxu1 %vm289_vm1, %v256_v25 }
  0x35   : > { %1272 = vmatmul.mubr.msk.f32.gmra.mxu0 %vm289_vm1, %v231_v26  ;;  %1311 = vmatmul.mubr.msk.f32.gmra.mxu1 %vm289_vm1, %v257_v27 }
  0x36   : > { %1274 = vmatprep.mubr.msk.f32.mxu0 %vm289_vm1, %v232_v28  ;;  %1313 = vmatprep.mubr.msk.f32.mxu1 %vm289_vm1, %v258_v29 }
  0x39   : > { %1275 = vmatmul.mubr.msk.f32.gmra.mxu0 %vm289_vm1, %v233_v30  ;;  %1314 = vmatmul.mubr.msk.f32.gmra.mxu1 %vm289_vm1, %v259_v31 }
  0x3a   : > { %1277 = vmatprep.mubr.msk.f32.mxu0 %vm289_vm1, %v234_v32  ;;  %1316 = vmatprep.mubr.msk.f32.mxu1 %vm289_vm1, %v260_v33 }
  0x3d   : > { %1278 = vmatmul.mubr.msk.f32.gmra.mxu0 %vm289_vm1, %v235_v34  ;;  %1317 = vmatmul.mubr.msk.f32.gmra.mxu1 %vm289_vm1, %v261_v35 }
  0x3e   : > { %1280 = vmatprep.mubr.msk.f32.mxu0 %vm289_vm1, %v236_v36  ;;  %1319 = vmatprep.mubr.msk.f32.mxu1 %vm289_vm1, %v262_v37 }
  0x41   : > { %1281 = vmatmul.mubr.msk.f32.gmra.mxu0 %vm289_vm1, %v237_v38  ;;  %1320 = vmatmul.mubr.msk.f32.gmra.mxu1 %vm289_vm1, %v263_v39 }
  0x42   : > { %1283 = vmatprep.mubr.msk.f32.mxu0 %vm289_vm1, %v238_v40  ;;  %1322 = vmatprep.mubr.msk.f32.mxu1 %vm289_vm1, %v264_v41 }
  0x45   : > { %1284 = vmatmul.mubr.msk.f32.gmra.mxu0 %vm289_vm1, %v239_v42  ;;  %1323 = vmatmul.mubr.msk.f32.gmra.mxu1 %vm289_vm1, %v265_v43 }
  0x46   : > { %1286 = vmatprep.mubr.msk.f32.mxu0 %vm289_vm1, %v240_v44  ;;  %1325 = vmatprep.mubr.msk.f32.mxu1 %vm289_vm1, %v266_v45 }
  0x49   : > { %1287 = vmatmul.mubr.msk.f32.gmra.mxu0 %vm289_vm1, %v241_v46  ;;  %1326 = vmatmul.mubr.msk.f32.gmra.mxu1 %vm289_vm1, %v267_v47 }
  0x4a   : > { %1289 = vmatprep.mubr.msk.f32.mxu0 %vm289_vm1, %v242_v48  ;;  %1328 = vmatprep.mubr.msk.f32.mxu1 %vm289_vm1, %v268_v49  ;;  %v1167_v48 = vld [vmem:[%s1930_s3 + $0x68] sm:$0xff]  ;;  %v866_v49 = vld [vmem:[%s1930_s3] sm:$0xff] }
  0x4d   : > { %1290 = vmatmul.mubr.msk.f32.gmra.mxu0 %vm289_vm1, %v243_v50  ;;  %1329 = vmatmul.mubr.msk.f32.gmra.mxu1 %vm289_vm1, %v269_v51 }
  0x4e   : > { %1292 = vmatprep.mubr.msk.f32.mxu0 %vm289_vm1, %v244_v52  ;;  %1331 = vmatprep.mubr.msk.f32.mxu1 %vm289_vm1, %v270_v53 }
  0x51   : > { %1293 = vmatmul.mubr.msk.f32.gmra.mxu0 %vm289_vm1, %v245_v54  ;;  %1332 = vmatmul.mubr.msk.f32.gmra.mxu1 %vm289_vm1, %v271_v55 }
  0x52   : > { %1295 = vmatprep.mubr.msk.f32.mxu0 %vm289_vm1, %v246_v56  ;;  %1334 = vmatprep.mubr.msk.f32.mxu1 %vm289_vm1, %v272_v57 }
  0x55   : > { %1296 = vmatmul.mubr.msk.f32.gmra.mxu0 %vm289_vm1, %v247_v58  ;;  %1335 = vmatmul.mubr.msk.f32.gmra.mxu1 %vm289_vm1, %v273_v59 }
  0xe5   : > { %v1261_v60 = vpop.f32.mrf.mxu0  ;;  %v1300_v61 = vpop.f32.mrf.mxu1 }
  0xe6   : > { %v522_v37 = vadd.f32 %v1261_v60, %v1704_v18  ;;  %v652_v38 = vadd.f32 %v1300_v61, %v1704_v18 }
  0xe7   : > { %v516_v62 = vpop.f32.mrf.mxu0  ;;  %v646_v63 = vpop.f32.mrf.mxu1 }
  0xe8   : > { %v517_v21 = vadd.f32 %v1704_v18, %v516_v62  ;;  %v647_v22 = vadd.f32 %v1704_v18, %v646_v63  ;;  %v776_v56 = vmax.f32 %v522_v37, 0.0  ;;  %v802_v57 = vmax.f32 %v652_v38, 0.0 }
  0xe9   : > { %v1669_v0 = vpop.f32.mrf.mxu0  ;;  %v1671_v1 = vpop.f32.mrf.mxu1 }
  0xea   : > { %v775_v29 = vmax.f32 %v517_v21, 0.0  ;;  %v801_v30 = vmax.f32 %v647_v22, 0.0  ;;  %v532_v38 = vadd.f32 %v1669_v0, %v1704_v18  ;;  %v1168_v0 = vld [vmem:[%s1930_s3 + $0x70] sm:$0xff] }
  0xeb   : > { %v526_v2 = vpop.f32.mrf.mxu0  ;;  %v656_v3 = vpop.f32.mrf.mxu1 }
  0xec   : > { %v527_v33 = vadd.f32 %v1704_v18, %v526_v2  ;;  %v657_v34 = vadd.f32 %v1704_v18, %v656_v3 }
  0xed   : > { %v1673_v4 = vpop.f32.mrf.mxu0  ;;  %v1675_v5 = vpop.f32.mrf.mxu1 }
  0xee   : > { %v777_v50 = vmax.f32 %v527_v33, 0.0  ;;  %v803_v51 = vmax.f32 %v657_v34, 0.0  ;;  %v1169_v33 = vld [vmem:[%s1930_s3 + $0x78] sm:$0xff]  ;;  %v868_v34 = vld [vmem:[%s1930_s3 + $0x10] sm:$0xff] }
  0xef   : > { %v1677_v6 = vpop.f32.mrf.mxu0  ;;  %v1679_v7 = vpop.f32.mrf.mxu1 }
  0xf1   : > { %v1681_v8 = vpop.f32.mrf.mxu0  ;;  %v1683_v9 = vpop.f32.mrf.mxu1 }
  0xf3   : > { %v1685_v10 = vpop.f32.mrf.mxu0  ;;  %v1687_v11 = vpop.f32.mrf.mxu1 }
  0xf5   : > { %v1689_v12 = vpop.f32.mrf.mxu0  ;;  %v1691_v13 = vpop.f32.mrf.mxu1 }
  0xf7   : > { %v1693_v14 = vpop.f32.mrf.mxu0  ;;  %v1695_v15 = vpop.f32.mrf.mxu1 }
  0xf9   : > { %v1697_v16 = vpop.f32.mrf.mxu0  ;;  %v1699_v17 = vpop.f32.mrf.mxu1 }
  0xfb   : > { %v1706_v19 = vpop.f32.mrf.mxu0  ;;  %v1708_v20 = vpop.f32.mrf.mxu1 }
  0xfd   : > { %v1279_v23 = vpop.f32.mrf.mxu0  ;;  %v1318_v24 = vpop.f32.mrf.mxu1 }
  0xfe   : > { %v582_v25 = vadd.f32 %v1279_v23, %v1704_v18  ;;  %v712_v26 = vadd.f32 %v1318_v24, %v1704_v18 }
  0xff   : > { %v1714_v27 = vpop.f32.mrf.mxu0  ;;  %v1716_v28 = vpop.f32.mrf.mxu1 }
 0x100   : > { %v788_v31 = vmax.f32 %v582_v25, 0.0  ;;  %v814_v32 = vmax.f32 %v712_v26, 0.0 }
 0x101   : > { %v1282_v35 = vpop.f32.mrf.mxu0  ;;  %v1321_v36 = vpop.f32.mrf.mxu1 }
 0x102   : > { %v827_v39 = vmax.f32 %v775_v29, %v788_v31  ;;  %v840_v40 = vmax.f32 %v801_v30, %v814_v32  ;;  %v592_v41 = vadd.f32 %v1282_v35, %v1704_v18  ;;  %v722_v42 = vadd.f32 %v1321_v36, %v1704_v18 }
 0x103   : > { %v586_v43 = vpop.f32.mrf.mxu0  ;;  %v716_v44 = vpop.f32.mrf.mxu1  ;;  %v537_v31 = vadd.f32 %v1704_v18, %v1677_v6  ;;  %v667_v32 = vadd.f32 %v1704_v18, %v1679_v7  ;;  %v662_v6 = vadd.f32 %v1671_v1, %v1704_v18 }
 0x104   : > { %v587_v45 = vadd.f32 %v1704_v18, %v586_v43  ;;  %v717_v46 = vadd.f32 %v1704_v18, %v716_v44  ;;  %v853_v47 = vmax.f32 %v827_v39, %v840_v40  ;;  %v790_v52 = vmax.f32 %v592_v41, 0.0 }
 0x105   : > { %v816_v53 = vmax.f32 %v722_v42, 0.0  ;;  %v1285_v54 = vpop.f32.mrf.mxu0  ;;  %v1324_v55 = vpop.f32.mrf.mxu1  ;;  %v542_v44 = vadd.f32 %v1673_v4, %v1704_v18  ;;  %v867_v4 = vld [vmem:[%s1930_s3 + $0x8] sm:$0xff] }
 0x106   : > { %v789_v58 = vmax.f32 %v587_v45, 0.0  ;;  %v815_v59 = vmax.f32 %v717_v46, 0.0  ;;  %v829_v60 = vmax.f32 %v777_v50, %v790_v52  ;;  %v964_v2 = vmul.f32 %v1167_v48, %v853_v47 }
 0x107   : > { %v842_v61 = vmax.f32 %v803_v51, %v816_v53  ;;  %v596_v62 = vpop.f32.mrf.mxu0  ;;  %v726_v63 = vpop.f32.mrf.mxu1  ;;  %v879_v3 = vmul.f32 %v866_v49, %v853_v47  ;;  %v602_v21 = vadd.f32 %v1285_v54, %v1704_v18  ;;  %v732_v22 = vadd.f32 %v1324_v55, %v1704_v18 }
 0x108   : > { %v828_v23 = vmax.f32 %v776_v56, %v789_v58  ;;  %v841_v24 = vmax.f32 %v802_v57, %v815_v59  ;;  %v977_v29 = vsel %vm892_vm2, %v964_v2, 0.0  ;;  %v597_v40 = vadd.f32 %v1704_v18, %v596_v62 }
 0x109   : > { %v1288_v25 = vpop.f32.mrf.mxu0  ;;  %v1327_v26 = vpop.f32.mrf.mxu1  ;;  %v893_v30 = vsel %vm892_vm2, %v879_v3, 0.0  ;;  %978 = vadd.xlane.f32.xlu1 %v977_v29  ;;  %v855_v37 = vmax.f32 %v829_v60, %v842_v61  ;;  %v792_v7 = vmax.f32 %v602_v21, 0.0  ;;  %v818_v39 = vmax.f32 %v732_v22, 0.0 }
 0x10a   : > { %894 = vadd.xlane.f32.xlu0 %v893_v30  ;;  %v854_v43 = vmax.f32 %v828_v23, %v841_v24  ;;  %v779_v45 = vmax.f32 %v537_v31, 0.0  ;;  %v805_v46 = vmax.f32 %v667_v32, 0.0  ;;  %v727_v47 = vadd.f32 %v1704_v18, %v726_v63  ;;  %v1171_v30 = vld [vmem:[%s1930_s3 + $0x88] sm:$0xff] }
 0x10b   : > { %v606_v35 = vpop.f32.mrf.mxu0  ;;  %v736_v36 = vpop.f32.mrf.mxu1  ;;  %v966_v41 = vmul.f32 %v1169_v33, %v855_v37  ;;  %v881_v42 = vmul.f32 %v868_v34, %v855_v37  ;;  %v612_v1 = vadd.f32 %v1288_v25, %v1704_v18  ;;  %v742_v48 = vadd.f32 %v1327_v26, %v1704_v18 }
 0x10c   : > { %v778_v53 = vmax.f32 %v532_v38, 0.0  ;;  %v547_v54 = vadd.f32 %v1704_v18, %v1685_v10  ;;  %v677_v55 = vadd.f32 %v1704_v18, %v1687_v11  ;;  %v831_v56 = vmax.f32 %v779_v45, %v792_v7 }
 0x10d   : > { %v1291_v49 = vpop.f32.mrf.mxu0  ;;  %v1330_v50 = vpop.f32.mrf.mxu1  ;;  %v983_v51 = vsel %vm892_vm2, %v966_v41, 0.0  ;;  %v899_v52 = vsel %vm892_vm2, %v881_v42, 0.0  ;;  %v844_v57 = vmax.f32 %v805_v46, %v818_v39  ;;  %v791_v58 = vmax.f32 %v597_v40, 0.0 }
 0x10e   : > { %984 = vadd.xlane.f32.xlu1 %v983_v51  ;;  %900 = vadd.xlane.f32.xlu0 %v899_v52  ;;  %v607_v59 = vadd.f32 %v1704_v18, %v606_v35  ;;  %v965_v60 = vmul.f32 %v1168_v0, %v854_v43  ;;  %v804_v61 = vmax.f32 %v662_v6, 0.0  ;;  %v817_v62 = vmax.f32 %v727_v47, 0.0 }
 0x10f   : > { %v737_v63 = vadd.f32 %v1704_v18, %v736_v36  ;;  %v880_v2 = vmul.f32 %v867_v4, %v854_v43  ;;  %v672_v3 = vadd.f32 %v1675_v5, %v1704_v18  ;;  %v794_v10 = vmax.f32 %v612_v1, 0.0  ;;  %v616_v22 = vpop.f32.mrf.mxu0  ;;  %v746_v11 = vpop.f32.mrf.mxu1  ;;  %v870_v5 = vld [vmem:[%s1930_s3 + $0x20] sm:$0xff] }
 0x110   : > { %v820_v21 = vmax.f32 %v742_v48, 0.0  ;;  %v980_v23 = vsel %vm892_vm2, %v965_v60, 0.0  ;;  %v780_v24 = vmax.f32 %v542_v44, 0.0  ;;  %v781_v25 = vmax.f32 %v547_v54, 0.0  ;;  %v1173_v60 = vld [vmem:[%s1930_s3 + $0x98] sm:$0xff] }
 0x111   : > { %v807_v26 = vmax.f32 %v677_v55, 0.0  ;;  %v896_v29 = vsel %vm892_vm2, %v880_v2, 0.0  ;;  %v557_v31 = vadd.f32 %v1704_v18, %v1693_v14  ;;  %v830_v32 = vmax.f32 %v778_v53, %v791_v58  ;;  %v1294_v39 = vpop.f32.mrf.mxu0  ;;  %v1333_v40 = vpop.f32.mrf.mxu1 }
 0x112   : > { %981 = vadd.xlane.f32.xlu1 %v980_v23  ;;  %v793_v33 = vmax.f32 %v607_v59, 0.0  ;;  %897 = vadd.xlane.f32.xlu0 %v896_v29  ;;  %v857_v34 = vmax.f32 %v831_v56, %v844_v57  ;;  %v843_v35 = vmax.f32 %v804_v61, %v817_v62  ;;  %v819_v36 = vmax.f32 %v737_v63, 0.0 }
 0x113   : > { %v622_v37 = vadd.f32 %v1291_v49, %v1704_v18  ;;  %v752_v38 = vadd.f32 %v1330_v50, %v1704_v18  ;;  %v833_v6 = vmax.f32 %v781_v25, %v794_v10  ;;  %v846_v7 = vmax.f32 %v807_v26, %v820_v21  ;;  %v626_v4 = vpop.f32.mrf.mxu0  ;;  %v756_v53 = vpop.f32.mrf.mxu1 }
 0x114   : > { %v968_v41 = vmul.f32 %v1171_v30, %v857_v34  ;;  %v883_v42 = vmul.f32 %v870_v5, %v857_v34  ;;  %v806_v43 = vmax.f32 %v672_v3, 0.0  ;;  %v687_v14 = vadd.f32 %v1704_v18, %v1695_v15  ;;  %v1170_v15 = vld [vmem:[%s1930_s3 + $0x80] sm:$0xff] }
 0x115   : > { %v617_v44 = vadd.f32 %v1704_v18, %v616_v22  ;;  %v552_v45 = vadd.f32 %v1681_v8, %v1704_v18  ;;  %v832_v46 = vmax.f32 %v780_v24, %v793_v33  ;;  %v796_v48 = vmax.f32 %v622_v37, 0.0  ;;  %v869_v8 = vld [vmem:[%s1930_s3 + $0x18] sm:$0xff]  ;;  %v1336_v22 = vpop.f32.mrf.mxu1 }
 0x116   : > { %v989_v47 = vsel %vm892_vm2, %v968_v41, 0.0  ;;  %v905_v0 = vsel %vm892_vm2, %v883_v42, 0.0  ;;  %v845_v1 = vmax.f32 %v806_v43, %v819_v36  ;;  %v822_v49 = vmax.f32 %v752_v38, 0.0 }
 0x117   : > { %v747_v50 = vadd.f32 %v1704_v18, %v746_v11  ;;  %990 = vadd.xlane.f32.xlu1 %v989_v47  ;;  %906 = vadd.xlane.f32.xlu0 %v905_v0  ;;  %v682_v51 = vadd.f32 %v1683_v9, %v1704_v18  ;;  %v783_v52 = vmax.f32 %v557_v31, 0.0  ;;  %v856_v54 = vmax.f32 %v830_v32, %v843_v35  ;;  %v872_v9 = vld [vmem:[%s1930_s3 + $0x30] sm:$0xff]  ;;  %v871_v32 = vld [vmem:[%s1930_s3 + $0x28] sm:$0xff] }
 0x118   : > { %v859_v55 = vmax.f32 %v833_v6, %v846_v7  ;;  %v809_v56 = vmax.f32 %v687_v14, 0.0  ;;  %v567_v57 = vadd.f32 %v1704_v18, %v1706_v19  ;;  %v697_v58 = vadd.f32 %v1704_v18, %v1708_v20  ;;  %v1297_v20 = vpop.f32.mrf.mxu0  ;;  %v1172_v31 = vld [vmem:[%s1930_s3 + $0x90] sm:$0xff] }
 0x119   : > { %v795_v59 = vmax.f32 %v617_v44, 0.0  ;;  %v632_v61 = vadd.f32 %v1294_v39, %v1704_v18  ;;  %v762_v62 = vadd.f32 %v1333_v40, %v1704_v18  ;;  %v967_v63 = vmul.f32 %v1170_v15, %v856_v54  ;;  %v766_v39 = vpop.f32.mrf.mxu1  ;;  %v1175_v44 = vld [vmem:[%s1930_s3 + $0xa8] sm:$0xff] }
 0x11a   : > { %v882_v2 = vmul.f32 %v869_v8, %v856_v54  ;;  %v835_v3 = vmax.f32 %v783_v52, %v796_v48  ;;  %v848_v19 = vmax.f32 %v809_v56, %v822_v49  ;;  %v821_v10 = vmax.f32 %v747_v50, 0.0  ;;  %v636_v7 = vpop.f32.mrf.mxu0  ;;  %v873_v56 = vld [vmem:[%s1930_s3 + $0x38] sm:$0xff] }
 0x11b   : > { %v858_v21 = vmax.f32 %v832_v46, %v845_v1  ;;  %v986_v11 = vsel %vm892_vm2, %v967_v63, 0.0  ;;  %v970_v24 = vmul.f32 %v1173_v60, %v859_v55  ;;  %v885_v25 = vmul.f32 %v872_v9, %v859_v55  ;;  %v1174_v55 = vld [vmem:[%s1930_s3 + $0xa0] sm:$0xff] }
 0x11c   : > { %v902_v23 = vsel %vm892_vm2, %v882_v2, 0.0  ;;  %v782_v26 = vmax.f32 %v552_v45, 0.0  ;;  %v808_v29 = vmax.f32 %v682_v51, 0.0  ;;  %v562_v30 = vadd.f32 %v1689_v12, %v1704_v18  ;;  %987 = vadd.xlane.f32.xlu1 %v986_v11  ;;  %v874_v45 = vld [vmem:[%s1930_s3 + $0x40] sm:$0xff] }
 0x11d   : > { %v785_v5 = vmax.f32 %v567_v57, 0.0  ;;  %903 = vadd.xlane.f32.xlu0 %v902_v23  ;;  %v811_v33 = vmax.f32 %v697_v58, 0.0  ;;  %v798_v34 = vmax.f32 %v632_v61, 0.0  ;;  %v824_v35 = vmax.f32 %v762_v62, 0.0 }
 0x11e   : > { %v627_v36 = vadd.f32 %v1704_v18, %v626_v4  ;;  %v834_v37 = vmax.f32 %v782_v26, %v795_v59  ;;  %v847_v38 = vmax.f32 %v808_v29, %v821_v10  ;;  %v757_v12 = vadd.f32 %v1704_v18, %v756_v53 }
 0x11f   : > { %v861_v6 = vmax.f32 %v835_v3, %v848_v19  ;;  %v995_v40 = vsel %vm892_vm2, %v970_v24, 0.0  ;;  %v911_v41 = vsel %vm892_vm2, %v885_v25, 0.0  ;;  %v969_v42 = vmul.f32 %v1172_v31, %v858_v21  ;;  %v1177_v3 = vld [vmem:[%s1930_s3 + $0xb8] sm:$0xff] }
 0x120   : > { %v884_v43 = vmul.f32 %v871_v32, %v858_v21  ;;  %v692_v14 = vadd.f32 %v1691_v13, %v1704_v18  ;;  %996 = vadd.xlane.f32.xlu1 %v995_v40  ;;  %v784_v46 = vmax.f32 %v562_v30, 0.0  ;;  %v837_v47 = vmax.f32 %v785_v5, %v798_v34 }
 0x121   : > { %912 = vadd.xlane.f32.xlu0 %v911_v41  ;;  %v850_v0 = vmax.f32 %v811_v33, %v824_v35  ;;  %v797_v1 = vmax.f32 %v627_v36, 0.0  ;;  %v823_v48 = vmax.f32 %v757_v12, 0.0  ;;  %v637_v49 = vadd.f32 %v1704_v18, %v636_v7  ;;  %v877_v7 = vld [vmem:[%s1930_s3 + $0x58] sm:$0xff] }
 0x122   : > { %v767_v50 = vadd.f32 %v1704_v18, %v766_v39  ;;  %v860_v13 = vmax.f32 %v834_v37, %v847_v38  ;;  %v992_v15 = vsel %vm892_vm2, %v969_v42, 0.0  ;;  %v908_v8 = vsel %vm892_vm2, %v884_v43, 0.0 }
 0x123   : > { %v972_v51 = vmul.f32 %v1175_v44, %v861_v6  ;;  %v887_v52 = vmul.f32 %v874_v45, %v861_v6  ;;  %v810_v4 = vmax.f32 %v692_v14, 0.0  ;;  %v572_v53 = vadd.f32 %v1697_v16, %v1704_v18  ;;  %v1178_v6 = vld [vmem:[%s1930_s3 + $0xc0] sm:$0xff]  ;;  %v1179_v14 = vld [vmem:[%s1930_s3 + $0xc8] sm:$0xff] }
 0x124   : > { %v702_v54 = vadd.f32 %v1699_v17, %v1704_v18  ;;  %993 = vadd.xlane.f32.xlu1 %v992_v15  ;;  %v836_v57 = vmax.f32 %v784_v46, %v797_v1  ;;  %v642_v58 = vadd.f32 %v1297_v20, %v1704_v18  ;;  %v772_v59 = vadd.f32 %v1336_v22, %v1704_v18  ;;  %v876_v22 = vld [vmem:[%s1930_s3 + $0x50] sm:$0xff]  ;;  %v878_v44 = vld [vmem:[%s1930_s3 + $0x60] sm:$0xff] }
 0x125   : > { %909 = vadd.xlane.f32.xlu0 %v908_v8  ;;  %v849_v60 = vmax.f32 %v810_v4, %v823_v48  ;;  %v799_v16 = vmax.f32 %v637_v49, 0.0  ;;  %v825_v9 = vmax.f32 %v767_v50, 0.0  ;;  %v863_v61 = vmax.f32 %v837_v47, %v850_v0 }
 0x126   : > { %v1001_v17 = vsel %vm892_vm2, %v972_v51, 0.0  ;;  %v917_v62 = vsel %vm892_vm2, %v887_v52, 0.0  ;;  %v971_v63 = vmul.f32 %v1174_v55, %v860_v13  ;;  %v886_v2 = vmul.f32 %v873_v56, %v860_v13 }
 0x127   : > { %v786_v19 = vmax.f32 %v572_v53, 0.0  ;;  %v812_v10 = vmax.f32 %v702_v54, 0.0  ;;  %v577_v21 = vadd.f32 %v1704_v18, %v1714_v27  ;;  %v707_v20 = vadd.f32 %v1704_v18, %v1716_v28  ;;  %v1176_v18 = vld [vmem:[%s1930_s3 + $0xb0] sm:$0xff]  ;;  %v875_v28 = vld [vmem:[%s1930_s3 + $0x48] sm:$0xff] }
 0x128   : > { %1002 = vadd.xlane.f32.xlu1 %v1001_v17  ;;  %v800_v11 = vmax.f32 %v642_v58, 0.0  ;;  %v826_v23 = vmax.f32 %v772_v59, 0.0  ;;  %v974_v26 = vmul.f32 %v1177_v3, %v863_v61  ;;  %v998_v29 = vsel %vm892_vm2, %v971_v63, 0.0 }
 0x129   : > { %918 = vadd.xlane.f32.xlu0 %v917_v62  ;;  %v838_v24 = vmax.f32 %v786_v19, %v799_v16  ;;  %v851_v25 = vmax.f32 %v812_v10, %v825_v9  ;;  %v914_v30 = vsel %vm892_vm2, %v886_v2, 0.0  ;;  %v889_v5 = vmul.f32 %v876_v22, %v863_v61 }
 0x12a   : > { %v862_v27 = vmax.f32 %v836_v57, %v849_v60  ;;  %v787_v31 = vmax.f32 %v577_v21, 0.0  ;;  %v813_v32 = vmax.f32 %v707_v20, 0.0  ;;  %v1007_v36 = vsel %vm892_vm2, %v974_v26, 0.0 }
 0x12b   : > { %v864_v35 = vmax.f32 %v838_v24, %v851_v25  ;;  %v923_v37 = vsel %vm892_vm2, %v889_v5, 0.0 }
 0x12c   : > { %999 = vadd.xlane.f32.xlu1 %v998_v29  ;;  %v839_v33 = vmax.f32 %v787_v31, %v800_v11  ;;  %v852_v34 = vmax.f32 %v813_v32, %v826_v23  ;;  %v973_v38 = vmul.f32 %v1176_v18, %v862_v27  ;;  %v888_v12 = vmul.f32 %v875_v28, %v862_v27 }
 0x12d   : > { %915 = vadd.xlane.f32.xlu0 %v914_v30  ;;  %v975_v42 = vmul.f32 %v1178_v6, %v864_v35  ;;  %v890_v43 = vmul.f32 %v877_v7, %v864_v35 }
 0x12e   : > { %v865_v39 = vmax.f32 %v839_v33, %v852_v34  ;;  %v1004_v40 = vsel %vm892_vm2, %v973_v38, 0.0  ;;  %v920_v41 = vsel %vm892_vm2, %v888_v12, 0.0 }
 0x12f   : > { %v1010_v45 = vsel %vm892_vm2, %v975_v42, 0.0  ;;  %v926_v46 = vsel %vm892_vm2, %v890_v43, 0.0 }
 0x130   : > { %1008 = vadd.xlane.f32.xlu1 %v1007_v36  ;;  %v976_v47 = vmul.f32 %v1179_v14, %v865_v39  ;;  %v891_v0 = vmul.f32 %v878_v44, %v865_v39 }
 0x131   : > { %924 = vadd.xlane.f32.xlu0 %v923_v37 }
 0x132   : > { %v1013_v1 = vsel %vm892_vm2, %v976_v47, 0.0  ;;  %v929_v48 = vsel %vm892_vm2, %v891_v0, 0.0 }
 0x134   : > { %1005 = vadd.xlane.f32.xlu1 %v1004_v40 }
 0x135   : > { %921 = vadd.xlane.f32.xlu0 %v920_v41 }
 0x138   : > { %1011 = vadd.xlane.f32.xlu1 %v1010_v45 }
 0x139   : > { %927 = vadd.xlane.f32.xlu0 %v926_v46 }
 0x13c   : > { %1014 = vadd.xlane.f32.xlu1 %v1013_v1  ;;  %v1036_v1 = vld [vmem:[%s1931_s4] sm:$0x1] }
 0x13d   : > { %930 = vadd.xlane.f32.xlu0 %v929_v48 }
 0x192   : > { %v979_v49 = vpop.xlane.xlu1 %978 }
 0x193   : > { %v895_v50 = vpop.xlane.xlu0 %894 }
 0x197   : > { %v985_v13 = vpop.xlane.xlu1 %984  ;;  %v901_v15 = vpop.xlane.xlu0 %900 }
 0x19b   : > { %v982_v8 = vpop.xlane.xlu1 %981  ;;  %v898_v51 = vpop.xlane.xlu0 %897 }
 0x19c   : > { %v1016_v55 = vadd.f32 %v982_v8, %v979_v49  ;;  %v932_v56 = vadd.f32 %v898_v51, %v895_v50 }
 0x19e   : > { %v1017_v59 = vadd.f32 %v1016_v55, %v985_v13  ;;  %v933_v60 = vadd.f32 %v932_v56, %v901_v15 }
 0x1a0   : > { %v991_v52 = vpop.xlane.xlu1 %990  ;;  %v907_v4 = vpop.xlane.xlu0 %906 }
 0x1a5   : > { %v988_v53 = vpop.xlane.xlu1 %987 }
 0x1a6   : > { %v904_v54 = vpop.xlane.xlu0 %903  ;;  %v1018_v16 = vadd.f32 %v1017_v59, %v988_v53 }
 0x1a7   : > { %v934_v9 = vadd.f32 %v933_v60, %v904_v54 }
 0x1a8   : > { %v1019_v62 = vadd.f32 %v1018_v16, %v991_v52 }
 0x1a9   : > { %v997_v57 = vpop.xlane.xlu1 %996  ;;  %v935_v63 = vadd.f32 %v934_v9, %v907_v4 }
 0x1aa   : > { %v913_v58 = vpop.xlane.xlu0 %912 }
 0x1ad   : > { %v994_v61 = vpop.xlane.xlu1 %993 }
 0x1ae   : > { %v910_v17 = vpop.xlane.xlu0 %909  ;;  %v1020_v19 = vadd.f32 %v1019_v62, %v994_v61 }
 0x1af   : > { %v936_v10 = vadd.f32 %v935_v63, %v910_v17 }
 0x1b0   : > { %v1021_v22 = vadd.f32 %v1020_v19, %v997_v57 }
 0x1b1   : > { %v1003_v2 = vpop.xlane.xlu1 %1002  ;;  %v937_v11 = vadd.f32 %v936_v10, %v913_v58 }
 0x1b2   : > { %v919_v3 = vpop.xlane.xlu0 %918 }
 0x1b5   : > { %v1000_v21 = vpop.xlane.xlu1 %999 }
 0x1b6   : > { %v916_v20 = vpop.xlane.xlu0 %915  ;;  %v1022_v23 = vadd.f32 %v1021_v22, %v1000_v21 }
 0x1b7   : > { %v938_v24 = vadd.f32 %v937_v11, %v916_v20 }
 0x1b8   : > { %v1023_v29 = vadd.f32 %v1022_v23, %v1003_v2 }
 0x1b9   : > { %v1009_v25 = vpop.xlane.xlu1 %1008  ;;  %v939_v30 = vadd.f32 %v938_v24, %v919_v3 }
 0x1ba   : > { %v925_v26 = vpop.xlane.xlu0 %924 }
 0x1bd   : > { %v1006_v5 = vpop.xlane.xlu1 %1005 }
 0x1be   : > { %v922_v27 = vpop.xlane.xlu0 %921  ;;  %v1024_v31 = vadd.f32 %v1023_v29, %v1006_v5 }
 0x1bf   : > { %v940_v32 = vadd.f32 %v939_v30, %v922_v27 }
 0x1c0   : > { %v1025_v18 = vadd.f32 %v1024_v31, %v1009_v25 }
 0x1c1   : > { %v941_v28 = vadd.f32 %v940_v32, %v925_v26  ;;  %v1012_v33 = vpop.xlane.xlu1 %1011 }
 0x1c2   : > { %v928_v34 = vpop.xlane.xlu0 %927  ;;  %v1026_v35 = vadd.f32 %v1025_v18, %v1012_v33 }
 0x1c3   : > { %v942_v36 = vadd.f32 %v941_v28, %v928_v34 }
 0x1c5   : > { %v1015_v37 = vpop.xlane.xlu1 %1014 }
 0x1c6   : > { %v931_v38 = vpop.xlane.xlu0 %930  ;;  %v1027_v12 = vadd.f32 %v1026_v35, %v1015_v37 }
 0x1c7   : > { %v943_v6 = vadd.f32 %v942_v36, %v931_v38 }
 0x1c8   : > { %v1028_v7 = vrot.slane %v1027_v12, 4 }
 0x1c9   : > { %v944_v39 = vrot.slane %v943_v6, 4 }
 0x1ca   : > { %v1029_v40 = vadd.f32 %v1028_v7, %v1027_v12 }
 0x1cb   : > { %v945_v41 = vadd.f32 %v944_v39, %v943_v6 }
 0x1cc   : > { %v1030_v42 = vrot.slane %v1029_v40, 2 }
 0x1cd   : > { %v946_v43 = vrot.slane %v945_v41, 2 }
 0x1ce   : > { %v1031_v14 = vadd.f32 %v1030_v42, %v1029_v40 }
 0x1cf   : > { %v947_v44 = vadd.f32 %v946_v43, %v945_v41 }
 0x1d0   : > { %v1032_v45 = vrot.slane %v1031_v14, 1 }
 0x1d1   : > { %v948_v46 = vrot.slane %v947_v44, 1 }
 0x1d2   : > { %v1033_v47 = vadd.f32 %v1032_v45, %v1031_v14 }
 0x1d3   : > { %v949_v0 = vadd.f32 %v948_v46, %v947_v44 }
 0x1d5   : > { %v1035_v48 = vsel %vm1034_vm3, %v949_v0, %v1033_v47 }
 0x1d6   : > { %v1037_v49 = vadd.f32 %v1036_v1, %v1035_v48 }
 0x1d8   : > { %1039 = vst.msk [vmem:[%s216_s26] sm:$0x1] %vm1038_vm4, %v1037_v49 }
 0x1d9   : > { %1406 = shalt.err (!%p1403_p3)
}
 0x1da   : > { %s1407_s13 = scalar_lea.hbm %s1051_s8, 16  ;;  %s1411_s16 = scalar_lea.hbm %s1932_s5, 32 }
 0x1db   : > { %p1408_p4 = scmp.ne.s32.totalorder %s1051_s8, %s1407_s13  ;;  %p1412_p9 = scmp.lt.s32.totalorder %s1051_s8, %s1932_s5 }
 0x1dc   : > { %p1413_p10 = scmp.lt.s32.totalorder %s1411_s16, %s1407_s13 }
 0x1dd   : > { %p1409_p7 = pnand %p1408_p4, %p1524_p5 }
 0x1de   : > { %p1414_p11 = por %p1413_p10, %p1412_p9 }
 0x1df   : > { %p1410_p8 = pneg %p1409_p7 }
 0x1e1   : > { %p1415_p12 = pnand %p1414_p11, %p1410_p8 }
 0x1e3   : > { %1418 = shalt.err (!%p1415_p12)
}
 0x1e4   : > { %1354 = dma.vmem_to_hbm [thread:$0]  (%p1524_p5), %s1054_s30, 16, %s1051_s8, %s1041_s9  }
 0x1e5 PF: > { %p1360_p13 = scmp.ge.s32.totalorder %s1453_s21, 2  ;;  %s1065_s25 = sand.u32 1, %s1441_s18  }
 0x1e6   : > { %s1066_s26 = scalar_lea.sflag [#allocation3], %s1065_s25 }
 0x1e7   : > { %p1357_p0 = pnand %p1360_p13, %p1528_p6 }
 0x1e9   : > { %p1358_p1 = pneg %p1357_p0 }
 0x1eb   : > { %1436 = dma.done.wait (%p1358_p1), %s1066_s26, 16  }
 0x1ec   : > { %1438 = vsyncadd (%p1358_p1), %s1066_s26, 4294967280  ;;  %p15_p2 = scmp.ge.s32.totalorder %s1511_s24, 4   ;;  %s1935_s18 = smov %s1445_s19 }
 0x1ed   : > { %s1936_s19 = smov %s1449_s20  ;;  %s1937_s20 = smov %s1522_s27 }
 0x1ee   : > { %s1938_s21 = smov %s1511_s24  ;;  %17 = sbr.rel (!%p15_p2) target bundleno = 3 (0x3), region = 76 }
 0x1f3   :  { %1070 = vsyncpa [#allocation3], 1 }
 0x1f4   :  { %1072 = vsyncpa [#allocation3 + $0x1], 1 }

</bundles_post_ra>
